<compile_context>
chip_gen: v7x
topology: tpu7x:2x2x1
jax: 0.10.0
libtpu: 0.0.40
codegen_flags: <defaults>
</compile_context>

<pallas_src>
import jax
import jax.numpy as jnp
from jax import lax
from jax.experimental import pallas as pl
from jax.experimental.pallas import tpu as pltpu


def _round_up(x, m):
    return (x + m - 1) // m * m


def mlp_kernel(x_ref, w1_ref, b1_ref, w2_ref, b2_ref, w3_ref, b3_ref, o_ref):
    # fc1: bf16 MXU matmul, f32 accumulate; bias + ReLU in f32 on the VPU.
    x_bf = x_ref[...].astype(jnp.bfloat16)                      # (TB, F)
    h1 = jnp.dot(x_bf, w1_ref[...], preferred_element_type=jnp.float32)
    h1 = jnp.maximum(h1 + b1_ref[...], 0.0)                     # (TB, 128) f32

    # fc2: hidden dim zero-padded 64 -> 128 so every vreg is full lane width.
    h2 = jnp.dot(h1.astype(jnp.bfloat16), w2_ref[...],
                 preferred_element_type=jnp.float32)
    h2 = jnp.maximum(h2 + b2_ref[...], 0.0)                     # (TB, 128) f32

    # fc3: contract the feature axis of both operands (NT matmul) so the
    # result comes out lane-dense as (8, TB); row 0 is the real output, rows
    # 1..7 of w3_ref are zero padding.  This avoids an N=1 MXU matmul and the
    # (TB, 1) masked-store / narrow-column DMA path.
    out8 = lax.dot_general(
        w3_ref[...], h2,
        dimension_numbers=(((1,), (1,)), ((), ())),
        preferred_element_type=jnp.float32)                     # (8, TB)

    b3 = b3_ref[0, 0]                                           # scalar in SMEM
    o_ref[...] = (out8[0:1, :] + b3)[None, :, :]                # (1, 1, TB)


def net_forward(x, w1, b1, w2, b2, w3, b3, *, tile_batch=2048):
    """y = fc3(relu(fc2(relu(fc1(x)))))  with weights stored as (in, out)."""
    B, F = x.shape
    H1 = w1.shape[1]                     # 128
    H2 = w2.shape[1]                     # 64
    H2P = _round_up(H2, 128)             # pad hidden-2 to a full lane width

    # Zero-pad hidden-2 (numerical no-op: padded h2 columns are relu(0)=0 and
    # the padded w3 rows are zero).
    w2p = jnp.pad(w2, ((0, 0), (0, H2P - H2)))
    b2p = jnp.pad(b2, ((0, 0), (0, H2P - H2)))
    # w3 as an (8, H2P) row block for the NT matmul (row 0 real, rows 1..7 zero).
    w3r = jnp.pad(w3.T, ((0, 7), (0, H2P - H2)))

    # bf16 MXU operands; accumulation stays f32 inside the kernel.
    w1b = w1.astype(jnp.bfloat16)
    w2b = w2p.astype(jnp.bfloat16)

    # Batch tiling (TB rows per grid step, weights resident across steps).
    TB = min(tile_batch, _round_up(B, 8))
    B_pad = _round_up(B, TB)
    if B_pad != B:
        x = jnp.pad(x, ((0, B_pad - B), (0, 0)))
    num_tiles = B_pad // TB

    resident = lambda shape: pl.BlockSpec(shape, lambda i: (0, 0))

    out = pl.pallas_call(
        mlp_kernel,
        out_shape=jax.ShapeDtypeStruct((num_tiles, 1, TB), jnp.float32),
        grid_spec=pltpu.PrefetchScalarGridSpec(
            num_scalar_prefetch=0,
            grid=(num_tiles,),
            in_specs=[
                pl.BlockSpec((TB, F), lambda i: (i, 0)),        # x: streamed
                resident((F, H1)),                              # w1 (bf16)
                resident((1, H1)),                              # b1
                resident((H1, H2P)),                            # w2 (bf16)
                resident((1, H2P)),                             # b2
                resident((8, H2P)),                             # w3 row block
                pl.BlockSpec(memory_space=pltpu.MemorySpace.SMEM),  # b3 scalar
            ],
            out_specs=pl.BlockSpec((1, 1, TB), lambda i: (i, 0, 0)),
        ),
        compiler_params=pltpu.CompilerParams(
            dimension_semantics=("parallel",),   # shard batch tiles on v7x's 2 TCs
        ),
    )(x, w1b, b1, w2b, b2p, w3r, b3)

    # (num_tiles, 1, TB) -> (B, 1); row-major flatten preserves batch order.
    return out.reshape(B_pad, 1)[:B]


def init_linear(key, in_features, out_features):
    """PyTorch-style uniform(-1/sqrt(fan_in), 1/sqrt(fan_in)), stored as (in, out)."""
    kw, kb = jax.random.split(key)
    bound = 1.0 / jnp.sqrt(jnp.float32(in_features))
    w = jax.random.uniform(kw, (in_features, out_features), jnp.float32, -bound, bound)
    b = jax.random.uniform(kb, (1, out_features), jnp.float32, -bound, bound)
    return w, b


if __name__ == "__main__":
    key = jax.random.PRNGKey(0)
    k_x, k1, k2, k3 = jax.random.split(key, 4)

    B = 8        # batch
    F_IN = 32    # stand-in for X.shape[1] (number of scaled features)

    # TODO(synk): StandardScaler preprocessing lives outside the nn.Module
    # forward; synthetic standard-normal inputs stand in for scaled features.
    x = jax.random.normal(k_x, (B, F_IN), jnp.float32)

    w1, b1 = init_linear(k1, F_IN, 128)
    w2, b2 = init_linear(k2, 128, 64)
    w3, b3 = init_linear(k3, 64, 1)

    fwd = jax.jit(net_forward)
    out = jax.block_until_ready(fwd(x, w1, b1, w2, b2, w3, b3))
    assert out.shape == (B, 1)

    # Reference in plain JAX with matching bf16 matmul operands / f32 accumulation.
    h1 = jnp.maximum(
        jnp.dot(x.astype(jnp.bfloat16), w1.astype(jnp.bfloat16),
                preferred_element_type=jnp.float32) + b1, 0.0)
    h2 = jnp.maximum(
        jnp.dot(h1.astype(jnp.bfloat16), w2.astype(jnp.bfloat16),
                preferred_element_type=jnp.float32) + b2, 0.0)
    ref = jnp.dot(h2, w3, preferred_element_type=jnp.float32) + b3

    assert jnp.allclose(out, ref, atol=1e-2, rtol=1e-2), \
        float(jnp.max(jnp.abs(out - ref)))

    print("KERNEL_OK")
</pallas_src>

<mosaic_0001>
module attributes {stable_mosaic.version = 11 : i64} {
  func.func @mlp_kernel(%arg0: i32, %arg1: memref<8x32xf32, #tpu.memory_space<vmem>>, %arg2: memref<32x128xbf16, #tpu.memory_space<vmem>>, %arg3: memref<1x128xf32, #tpu.memory_space<vmem>>, %arg4: memref<128x128xbf16, #tpu.memory_space<vmem>>, %arg5: memref<1x128xf32, #tpu.memory_space<vmem>>, %arg6: memref<8x128xf32, #tpu.memory_space<vmem>>, %arg7: memref<1x1xf32, #tpu.memory_space<smem>>, %arg8: memref<1x1x8xf32, #tpu.memory_space<vmem>>) attributes {dimension_semantics = [#tpu.dimension_semantics<parallel>], iteration_bounds = array<i64: 1>, scalar_prefetch = 0 : i64, scratch_operands = 0 : i64, tpu.core_type = #tpu.core_type<tc>, window_params = [{transform_indices = @transform_0, window_bounds = array<i64: 8, 32>}, {pipeline_mode = #tpu.pipeline_mode<synchronous>, transform_indices = @transform_1, window_bounds = array<i64: 32, 128>}, {pipeline_mode = #tpu.pipeline_mode<synchronous>, transform_indices = @transform_2, window_bounds = array<i64: 1, 128>}, {pipeline_mode = #tpu.pipeline_mode<synchronous>, transform_indices = @transform_3, window_bounds = array<i64: 128, 128>}, {pipeline_mode = #tpu.pipeline_mode<synchronous>, transform_indices = @transform_4, window_bounds = array<i64: 1, 128>}, {pipeline_mode = #tpu.pipeline_mode<synchronous>, transform_indices = @transform_5, window_bounds = array<i64: 8, 128>}, {transform_indices = @transform_6, window_bounds = array<i64: 1, 1>}, {transform_indices = @transform_7, window_bounds = array<i64: 1, 1, 8>}]} {
    %c0 = arith.constant 0 : index
    %c0_0 = arith.constant 0 : index
    %0 = vector.load %arg1[%c0, %c0_0] : memref<8x32xf32, #tpu.memory_space<vmem>>, vector<8x32xf32>
    %1 = arith.truncf %0 : vector<8x32xf32> to vector<8x32xbf16>
    %c0_1 = arith.constant 0 : index
    %c0_2 = arith.constant 0 : index
    %2 = vector.load %arg2[%c0_1, %c0_2] : memref<32x128xbf16, #tpu.memory_space<vmem>>, vector<32x128xbf16>
    %cst = arith.constant dense<0.000000e+00> : vector<8x128xf32>
    %3 = tpu.matmul %1, %2, %cst {dimension_numbers = #tpu.dot_dimension_numbers<[1], [0], [0], [1], [0, 0, 1, 1], [], []>} : vector<8x32xbf16>, vector<32x128xbf16>, vector<8x128xf32> -> vector<8x128xf32>
    %c0_3 = arith.constant 0 : index
    %c0_4 = arith.constant 0 : index
    %4 = vector.load %arg3[%c0_3, %c0_4] : memref<1x128xf32, #tpu.memory_space<vmem>>, vector<1x128xf32>
    %5 = vector.broadcast %4 : vector<1x128xf32> to vector<8x128xf32>
    %6 = arith.addf %3, %5 : vector<8x128xf32>
    %cst_5 = arith.constant 0.000000e+00 : f32
    %7 = vector.broadcast %cst_5 : f32 to vector<8x128xf32>
    %8 = arith.maximumf %6, %7 : vector<8x128xf32>
    %9 = arith.truncf %8 : vector<8x128xf32> to vector<8x128xbf16>
    %c0_6 = arith.constant 0 : index
    %c0_7 = arith.constant 0 : index
    %10 = vector.load %arg4[%c0_6, %c0_7] : memref<128x128xbf16, #tpu.memory_space<vmem>>, vector<128x128xbf16>
    %cst_8 = arith.constant dense<0.000000e+00> : vector<8x128xf32>
    %11 = tpu.matmul %9, %10, %cst_8 {dimension_numbers = #tpu.dot_dimension_numbers<[1], [0], [0], [1], [0, 0, 1, 1], [], []>} : vector<8x128xbf16>, vector<128x128xbf16>, vector<8x128xf32> -> vector<8x128xf32>
    %c0_9 = arith.constant 0 : index
    %c0_10 = arith.constant 0 : index
    %12 = vector.load %arg5[%c0_9, %c0_10] : memref<1x128xf32, #tpu.memory_space<vmem>>, vector<1x128xf32>
    %13 = vector.broadcast %12 : vector<1x128xf32> to vector<8x128xf32>
    %14 = arith.addf %11, %13 : vector<8x128xf32>
    %cst_11 = arith.constant 0.000000e+00 : f32
    %15 = vector.broadcast %cst_11 : f32 to vector<8x128xf32>
    %16 = arith.maximumf %14, %15 : vector<8x128xf32>
    %c0_12 = arith.constant 0 : index
    %c0_13 = arith.constant 0 : index
    %17 = vector.load %arg6[%c0_12, %c0_13] : memref<8x128xf32, #tpu.memory_space<vmem>>, vector<8x128xf32>
    %cst_14 = arith.constant dense<0.000000e+00> : vector<8x8xf32>
    %18 = tpu.matmul %17, %16, %cst_14 {dimension_numbers = #tpu.dot_dimension_numbers<[1], [1], [0], [0], [0, 0, 1, 0], [], []>} : vector<8x128xf32>, vector<8x128xf32>, vector<8x8xf32> -> vector<8x8xf32>
    %c0_15 = arith.constant 0 : index
    %c0_16 = arith.constant 0 : index
    %19 = memref.load %arg7[%c0_15, %c0_16] : memref<1x1xf32, #tpu.memory_space<smem>>
    %20 = vector.extract_strided_slice %18 {offsets = [0, 0], sizes = [1, 8], strides = [1, 1]} : vector<8x8xf32> to vector<1x8xf32>
    %21 = vector.broadcast %19 : f32 to vector<1x8xf32>
    %22 = arith.addf %20, %21 : vector<1x8xf32>
    %23 = vector.shape_cast %22 : vector<1x8xf32> to vector<1x1x8xf32>
    %c0_17 = arith.constant 0 : index
    %c0_18 = arith.constant 0 : index
    %c0_19 = arith.constant 0 : index
    %24 = vector.load %arg8[%c0_17, %c0_18, %c0_19] : memref<1x1x8xf32, #tpu.memory_space<vmem>>, vector<1x1x8xf32>
    tpu.vector_store %arg8[%c0_17, %c0_18, %c0_19], %23 {strides = array<i32>} : memref<1x1x8xf32, #tpu.memory_space<vmem>>, vector<1x1x8xf32>,
    return
  }
  func.func @transform_0(%arg0: i32) -> (i32, i32) {
    %c0_i32 = arith.constant 0 : i32
    %c0_i32_0 = arith.constant 0 : i32
    return %arg0, %c0_i32 : i32, i32
  }
  func.func @transform_1(%arg0: i32) -> (i32, i32) {
    %c0_i32 = arith.constant 0 : i32
    %c0_i32_0 = arith.constant 0 : i32
    %c0_i32_1 = arith.constant 0 : i32
    return %c0_i32, %c0_i32_0 : i32, i32
  }
  func.func @transform_2(%arg0: i32) -> (i32, i32) {
    %c0_i32 = arith.constant 0 : i32
    %c0_i32_0 = arith.constant 0 : i32
    %c0_i32_1 = arith.constant 0 : i32
    return %c0_i32, %c0_i32_0 : i32, i32
  }
  func.func @transform_3(%arg0: i32) -> (i32, i32) {
    %c0_i32 = arith.constant 0 : i32
    %c0_i32_0 = arith.constant 0 : i32
    %c0_i32_1 = arith.constant 0 : i32
    return %c0_i32, %c0_i32_0 : i32, i32
  }
  func.func @transform_4(%arg0: i32) -> (i32, i32) {
    %c0_i32 = arith.constant 0 : i32
    %c0_i32_0 = arith.constant 0 : i32
    %c0_i32_1 = arith.constant 0 : i32
    return %c0_i32, %c0_i32_0 : i32, i32
  }
  func.func @transform_5(%arg0: i32) -> (i32, i32) {
    %c0_i32 = arith.constant 0 : i32
    %c0_i32_0 = arith.constant 0 : i32
    %c0_i32_1 = arith.constant 0 : i32
    return %c0_i32, %c0_i32_0 : i32, i32
  }
  func.func @transform_6(%arg0: i32) -> (i32, i32) {
    %c0_i32 = arith.constant 0 : i32
    %c0_i32_0 = arith.constant 0 : i32
    %c0_i32_1 = arith.constant 0 : i32
    return %c0_i32, %c0_i32_0 : i32, i32
  }
  func.func @transform_7(%arg0: i32) -> (i32, i32, i32) {
    %c0_i32 = arith.constant 0 : i32
    %c0_i32_0 = arith.constant 0 : i32
    %c0_i32_1 = arith.constant 0 : i32
    return %arg0, %c0_i32, %c0_i32_0 : i32, i32, i32
  }
}

</mosaic_0001>

<bundles_post_ra>
// kernel: net_forward.1
= control target key start
LH: loop header
LB: loop body
LE: loop exit
PB: predicated region body
PF: predicated region fallthrough
CT: control target
= control target key end

     0   :  { %v399_v1 = vmov 0.0   ;;  %vm400_vm0 = vmmov 0   ;;  %vm54_vm1 = vcmask 261120   ;;  %s502_s0 = inlined_call_operand.vmem [shape: f32[8,32], index: 0, kind: input, shape index: {}]   ;;  %s503_s1 = inlined_call_operand.vmem [shape: bf16[32,128], index: 1, kind: input, shape index: {}]   ;;  %s504_s2 = inlined_call_operand.vmem [shape: f32[1,128], index: 2, kind: input, shape index: {}]   ;;  %s505_s3 = inlined_call_operand.vmem [shape: bf16[128,128], index: 3, kind: input, shape index: {}]   ;;  %s506_s4 = inlined_call_operand.vmem [shape: f32[1,128], index: 4, kind: input, shape index: {}]   ;;  %s507_s5 = inlined_call_operand.vmem [shape: f32[8,128], index: 5, kind: input, shape index: {}]   ;;  %s508_s6 = inlined_call_operand.<no memory space> [shape: f32[1,1], index: 6, kind: input, shape index: {}]   ;;  %s509_s7 = inlined_call_operand.hbm [shape: f32[1,1,8], index: 7, kind: output, shape index: {}]  }
   0x1   :  { %v365_v0 = vld [vmem:[%s503_s1] sm:$0xff]   ;;  %329 = vmatprep.subr.bf16.mxu0 %v399_v1  ;;  %v366_v2 = vld [vmem:[%s503_s1 + $0x8] sm:$0xff]   ;;  %337 = vmatprep.subr.bf16.mxu1 %v399_v1  ;;  %v369_v7 = vld [vmem:[%s505_s3 + $0x10] sm:$0xff]  }
   0x2   :  { %330 = vmatpush3.bf16.msra.mxu0 %v365_v0  ;;  %333 = vmatprep.mubr.msk.bf16.mxu0 %vm400_vm0, %v399_v1  ;;  %v29_v3 = vld [vmem:[%s502_s0] sm:$0xff]  ;;  %v368_v6 = vld [vmem:[%s505_s3 + $0x8] sm:$0xff]  }
   0x3   :  { %331 = vmatprep.subr.bf16.mxu0 %v399_v1  ;;  %v367_v4 = vld [vmem:[%s505_s3] sm:$0xff]   ;;  %353 = vmatprep.mubr.msk.bf16.mxu1 %vm400_vm0, %v399_v1  ;;  %v30_v5 = vpack.c.bf16 %v29_v3, %v29_v3 }
   0x4   :  { %338 = vmatpush3.bf16.msra.mxu1 %v367_v4 }
   0x5   :  { %339 = vmatprep.subr.bf16.mxu1 %v399_v1 }
   0x6   :  { %332 = vmatpush3.bf16.msra.mxu0 %v366_v2 }
   0x7   :  { %357 = vmatprep.subr.mxu0 %v399_v1 }
   0x8   :  { %340 = vmatpush3.bf16.msra.mxu1 %v368_v6 }
   0x9   :  { %334 = vmatmul.mubr.msk.bf16.vlgmr.msra.gmra.mrb[0].mxu0 %vm54_vm1, %v30_v5  ;;  %341 = vmatprep.subr.bf16.mxu1 %v399_v1 }
   0xa   :  { %359 = vmatprep.mubr.msk.f32.mxu0 %vm400_vm0, %v399_v1 }
   0xb   :  { %13 = vsyncpa [#allocation4], 0  ;;  %v370_v8 = vld [vmem:[%s505_s3 + $0x18] sm:$0xff]   ;;  %v371_v9 = vld [vmem:[%s505_s3 + $0x20] sm:$0xff]   ;;  %v284_v29 = vstv %s508_s6  ;;  %s401_s27 = smov [#allocation3]   ;;  %vm286_vm2 = vcmask 57344  }
   0xc   :  { %342 = vmatpush3.bf16.msra.mxu1 %v369_v7  ;;  %v372_v10 = vld [vmem:[%s505_s3 + $0x28] sm:$0xff]   ;;  %v373_v11 = vld [vmem:[%s505_s3 + $0x30] sm:$0xff]   ;;  %v374_v12 = vld [vmem:[%s505_s3 + $0x38] sm:$0xff]   ;;  %s294_s28 = sshll.u32 %s401_s27, 4  ;;  %s295_s28 = int_to_ptr.vmem [resolvable:$true] %s294_s28 }
   0xd   :  { %343 = vmatprep.subr.bf16.mxu1 %v399_v1  ;;  %v302_v13 = vld [vmem:[%s504_s2] ss:$0 sm:$0xff]  ;;  %s379_s29 = scalar_lea.vmem %s295_s28, 32  ;;  %p380_p1 = scmp.lt.s32.totalorder %s295_s28, %s295_s28 }
   0xe   :  { %v306_v21 = vld [vmem:[%s506_s4] ss:$0 sm:$0xff]  ;;  %s375_s4 = scalar_lea.vmem %s295_s28, 16 }
   0xf   :  { %v212_v28 = vld [vmem:[%s507_s5] sm:$0xff]  ;;  %p376_p0 = scmp.ne.s32.totalorder %s295_s28, %s375_s4  ;;  %p381_p2 = scmp.lt.s32.totalorder %s379_s29, %s375_s4 }
  0x10   :  { %344 = vmatpush3.bf16.msra.mxu1 %v370_v8 }
  0x11   :  { %345 = vmatprep.subr.bf16.mxu1 %v399_v1  ;;  %p382_p3 = por %p381_p2, %p380_p1 }
  0x13   :  { %p383_p4 = pnand %p382_p3, %p376_p0 }
  0x14   :  { %346 = vmatpush3.bf16.msra.mxu1 %v371_v9 }
  0x15   :  { %347 = vmatprep.subr.bf16.mxu1 %v399_v1 }
  0x18   :  { %348 = vmatpush3.bf16.msra.mxu1 %v372_v10 }
  0x19   :  { %349 = vmatprep.subr.bf16.mxu1 %v399_v1 }
  0x1c   :  { %350 = vmatpush3.bf16.msra.mxu1 %v373_v11 }
  0x1d   :  { %351 = vmatprep.subr.bf16.mxu1 %v399_v1 }
  0x20   :  { %352 = vmatpush3.bf16.msra.mxu1 %v374_v12 }
  0xdc   :  { %v92_v14 = vpop.f32.mrb[0].mxu0 }
  0xdd   :  { %v93_v15 = vadd.f32 %v302_v13, %v92_v14  ;;  %v335_v16 = vpop.f32.mrb[1].mxu0 }
  0xde   :  { %v95_v17 = vpop.f32.mrb[2].mxu0 }
  0xdf   :  { %v98_v18 = vmax.f32 %v93_v15, 0.0  ;;  %v336_v19 = vpop.f32.mrb[3].mxu0 }
  0xe1   :  { %v99_v20 = vpack.c.bf16 %v98_v18, %v98_v18 }
  0xe3   :  { %354 = vmatmul.mubr.bf16.vlgmr.msra.gmra.mrb[0].mxu1 %v99_v20 }
 0x1b6   :  { %v205_v22 = vpop.f32.mrb[0].mxu1 }
 0x1b7   :  { %v206_v23 = vadd.f32 %v306_v21, %v205_v22  ;;  %v355_v24 = vpop.f32.mrb[1].mxu1 }
 0x1b8   :  { %v208_v25 = vpop.f32.mrb[2].mxu1 }
 0x1b9   :  { %v211_v26 = vmax.f32 %v206_v23, 0.0  ;;  %v356_v27 = vpop.f32.mrb[3].mxu1 }
 0x1bb   :  { %358 = vmatpush3.xpose.msra.mxu0 %v211_v26 }
 0x1be   :  { %360 = vmatmul.mubr.f32.vlgmr.msra.gmra.mrb[4].mxu0 %v212_v28 }
 0x291   :  { %v279_v30 = vpop.f32.mrb[4].mxu0 }
 0x292   :  { %v285_v31 = vadd.f32 %v284_v29, %v279_v30  ;;  %v361_v32 = vpop.f32.mrb[5].mxu0 }
 0x294   :  { %287 = vst.msk [vmem:[#allocation3] sm:$0x1] %vm286_vm2, %v285_v31 }
 0x295   :  { %386 = shalt.err (!%p383_p4)
}
 0x296   :  { %s387_s6 = scalar_lea.hbm %s509_s7, 16 }
 0x297   :  { %p388_p5 = scmp.ne.s32.totalorder %s509_s7, %s387_s6  ;;  %p391_p6 = scmp.lt.u32.totalorder %s387_s6, %s509_s7 }
 0x299   :  { %p393_p7 = pnand %p391_p6, %p388_p5 }
 0x29b   :  { %396 = shalt.err (!%p393_p7)
}
 0x29c   :  { %297 = dma.vmem_to_hbm [thread:$0]  %s295_s28, 16, %s509_s7, [#allocation4]  }
 0x29d   :  { %397 = dma.done.wait [#allocation4], 16  }
 0x29e   :  { %398 = vsyncadd [#allocation4], 4294967280 }
 0x29f   :  { %301 = vsyncpa [#allocation4], 1 }

</bundles_post_ra>
